<compile_context>
chip_gen: v6e
topology: v6e:2x2x1
jax: 0.10.0
libtpu: 0.0.40
codegen_flags: <defaults>
</compile_context>

<pallas_src>
import math
import functools

import jax
import jax.numpy as jnp
from jax.experimental import pallas as pl
from jax.experimental.pallas import tpu as pltpu


def _round_up(x, m):
    return (x + m - 1) // m * m


def _vmem_capacity_bytes():
    try:
        return int(pltpu.get_tpu_info().vmem_capacity_bytes)
    except Exception:
        return 64 * 1024 * 1024          # conservative fallback (v7x per-TC)


def _choose_tm(n, hw, cinkk, c_out, in_bytes, out_bytes, vmem_cap, tm_max=2048):
    """Lane (M = H_out*W_out) tile: as big as the generation-aware VMEM budget
    allows, never larger than the array, and small enough that the parallel
    grid (N x HW tiles) keeps >= 2 steps for v7x's two TensorCores."""
    if hw <= 128:
        return hw                          # single block equal to the full dim
    tm = min(tm_max, (hw // 128) * 128)    # multiple of 128, always <= hw
    # v7x: keep >= 2 parallel steps whenever there is enough work to split.
    if n * pl.cdiv(hw, tm) < 2:
        tm = min(tm, _round_up(pl.cdiv(hw, 2), 128))
    # VMEM: double-buffered x/out blocks + double-buffered (resident) weights.
    w_bytes = c_out * cinkk * in_bytes
    budget = max(4 << 20, int(0.35 * vmem_cap) - 2 * w_bytes)

    def blocks_bytes(t):
        return 2 * cinkk * t * in_bytes + 2 * c_out * t * out_bytes

    while tm > 128 and blocks_bytes(tm) > budget:
        tm -= 128
    return tm


# ----------------------------- Pallas kernel ------------------------------ #
def _conv_mm_fused_kernel(w_ref, x_ref, b_ref, o_ref, *, negative_slope, scale,
                          add_bias, activate):
    # w_ref: (C_out, CinKK)   resident weights (compute dtype)
    # x_ref: (CinKK, tm)      im2col tile, tm (= H_out*W_out slice) on lanes
    # b_ref: (C_out, 1)       f32 bias column
    # o_ref: (C_out, tm)      lane-dense output tile
    acc = jnp.dot(w_ref[...], x_ref[...], preferred_element_type=jnp.float32)
    if add_bias:
        acc = acc + b_ref[...]                         # lane-broadcast, f32
    if activate:
        acc = jnp.where(acc >= 0, acc, negative_slope * acc)
        if scale != 1.0:                               # module fixes scale=1
            acc = acc * scale
    o_ref[...] = acc.astype(o_ref.dtype)


# ------------------------------- wrapper ----------------------------------- #
def volume_render_disc_conv2d(x_nchw, weight, bias=None, *, stride=1, padding=0,
                              activate=False, use_bias=True,
                              negative_slope=0.2, scale=1.0,
                              compute_dtype=jnp.bfloat16, tm_max=2048):
    """Forward pass of VolumeRenderDiscConv2d.

    x_nchw : (N, C_in, H, W)
    weight : (C_out, C_in, K, K)   (PyTorch Conv2d layout)
    bias   : (C_out,)              conv bias if not activate, else FusedLeakyReLU bias
    returns: (N, C_out, H_out, W_out)

    compute_dtype=jnp.bfloat16 halves operand HBM traffic (accumulation is
    always f32); pass jnp.float32 for a numerics-faithful validation path.
    negative_slope / scale must be static Python scalars (module contract).
    """
    N, C_in, H, W = x_nchw.shape
    C_out, _, K, _ = weight.shape
    H_out = (H + 2 * padding - K) // stride + 1
    W_out = (W + 2 * padding - K) // stride + 1
    HW = H_out * W_out
    CinKK = C_in * K * K
    out_dtype = x_nchw.dtype
    scale = float(scale)                      # must be static (module uses 1.0)
    negative_slope = float(negative_slope)

    # ---- glue: cast early, N-major transpose-free im2col -> (N, CinKK, HW) ----
    xp = x_nchw.astype(compute_dtype)
    if padding:
        xp = jnp.pad(xp, ((0, 0), (0, 0), (padding, padding), (padding, padding)))
    cols = [xp[:, :, ki:ki + H_out * stride:stride, kj:kj + W_out * stride:stride]
            for ki in range(K) for kj in range(K)]
    # (N, C_in, K*K, H', W') -> (N, C_in*K*K, H'*W'); flatten order matches
    # weight.reshape(C_out, C_in*K*K).  No transpose, no pad.
    x_col = jnp.stack(cols, axis=2).reshape(N, CinKK, HW)
    w_mat = weight.reshape(C_out, CinKK).astype(compute_dtype)

    add_bias = bool(use_bias) and (bias is not None)
    b_col = (bias.astype(jnp.float32) if add_bias
             else jnp.zeros((C_out,), jnp.float32)).reshape(C_out, 1)

    in_bytes = jnp.dtype(compute_dtype).itemsize
    out_bytes = jnp.dtype(out_dtype).itemsize
    vmem_cap = _vmem_capacity_bytes()
    tm = _choose_tm(N, HW, CinKK, C_out, in_bytes, out_bytes, vmem_cap, tm_max)
    n_hw = pl.cdiv(HW, tm)

    w_bytes = C_out * CinKK * in_bytes
    blk_bytes = 2 * CinKK * tm * in_bytes + 2 * C_out * tm * out_bytes
    need = blk_bytes + 2 * w_bytes + (4 << 20)          # + Mosaic scratch margin
    vmem_limit = int(max(16 << 20, min(need, int(0.6 * vmem_cap))))

    cost = pl.CostEstimate(
        flops=2 * N * HW * C_out * CinKK,
        transcendentals=0,
        bytes_accessed=(N * CinKK * HW * in_bytes + w_bytes + C_out * 4
                        + N * C_out * HW * out_bytes))

    kernel = functools.partial(
        _conv_mm_fused_kernel,
        negative_slope=negative_slope, scale=scale,
        add_bias=add_bias, activate=activate)

    out_flat = pl.pallas_call(
        kernel,
        out_shape=jax.ShapeDtypeStruct((N, C_out, HW), out_dtype),
        grid_spec=pltpu.PrefetchScalarGridSpec(
            num_scalar_prefetch=0,
            grid=(N, n_hw),
            in_specs=[
                pl.BlockSpec((C_out, CinKK), lambda n, i: (0, 0)),      # weights (resident)
                pl.BlockSpec((pl.Squeezed(), CinKK, tm),
                             lambda n, i: (n, 0, i)),                   # patch tile
                pl.BlockSpec((C_out, 1), lambda n, i: (0, 0)),          # bias
            ],
            out_specs=pl.BlockSpec((pl.Squeezed(), C_out, tm),
                                   lambda n, i: (n, 0, i)),             # lane-dense
        ),
        compiler_params=pltpu.CompilerParams(
            dimension_semantics=("parallel", "parallel"),
            vmem_limit_bytes=vmem_limit),
        cost_estimate=cost,
    )(w_mat, x_col, b_col)

    # Output is already N-major: reshape is free, no transpose, no slicing.
    return out_flat.reshape(N, C_out, H_out, W_out)


# -------------------------------- demo ------------------------------------ #
if __name__ == "__main__":
    N, C_in, H, W = 2, 4, 16, 16
    C_out, K = 8, 3

    key = jax.random.PRNGKey(0)
    kw, kb, kx = jax.random.split(key, 3)

    fan_in = C_in * K * K
    w_bound = 1.0 / math.sqrt(fan_in)
    weight = jax.random.uniform(kw, (C_out, C_in, K, K), jnp.float32,
                                -w_bound, w_bound)
    b_bound = math.sqrt(1.0 / fan_in)
    bias = jax.random.uniform(kb, (C_out,), jnp.float32, -b_bound, b_bound)
    x = jax.random.normal(kx, (N, C_in, H, W), jnp.float32)

    def ref_conv(x, w, b, stride, padding, activate):
        r = jax.lax.conv_general_dilated(
            x, w, window_strides=(stride, stride),
            padding=[(padding, padding), (padding, padding)],
            dimension_numbers=("NCHW", "OIHW", "NCHW"))
        r = r + b.reshape(1, -1, 1, 1)
        if activate:
            r = jnp.where(r >= 0, r, 0.2 * r) * 1.0
        return r

    # Case 1: activate=True (conv no-bias + FusedLeakyReLU bias, slope 0.2, scale 1), bf16 compute
    out1 = volume_render_disc_conv2d(
        x, weight, bias, stride=1, padding=1,
        activate=True, use_bias=True, negative_slope=0.2, scale=1.0)
    out1 = jax.block_until_ready(out1)
    ref1 = ref_conv(x, weight, bias, 1, 1, True)
    assert out1.shape == (N, C_out, H, W)
    assert jnp.allclose(out1, ref1, atol=2e-2, rtol=2e-2)

    # Case 2: plain conv + bias (activate=False), stride 2, f32 validation path
    out2 = volume_render_disc_conv2d(
        x, weight, bias, stride=2, padding=1,
        activate=False, use_bias=True, compute_dtype=jnp.float32)
    out2 = jax.block_until_ready(out2)
    ref2 = ref_conv(x, weight, bias, 2, 1, False)
    assert out2.shape == ref2.shape
    assert jnp.allclose(out2, ref2, atol=1e-2, rtol=1e-2)

    print("KERNEL_OK")
</pallas_src>

<mosaic_0001>
module attributes {stable_mosaic.version = 11 : i64} {
  func.func @_conv_mm_fused_kernel(%arg0: i32, %arg1: i32, %arg2: memref<8x36xbf16, #tpu.memory_space<vmem>>, %arg3: memref<1x36x256xbf16, #tpu.memory_space<vmem>>, %arg4: memref<8x1xf32, #tpu.memory_space<vmem>>, %arg5: memref<1x8x256xf32, #tpu.memory_space<vmem>>) attributes {dimension_semantics = [#tpu.dimension_semantics<parallel>, #tpu.dimension_semantics<parallel>], iteration_bounds = array<i64: 2, 1>, scalar_prefetch = 0 : i64, scratch_operands = 0 : i64, tpu.core_type = #tpu.core_type<tc>, window_params = [{pipeline_mode = #tpu.pipeline_mode<synchronous>, transform_indices = @transform_0, window_bounds = array<i64: 8, 36>}, {transform_indices = @transform_1, window_bounds = array<i64: 1, 36, 256>}, {pipeline_mode = #tpu.pipeline_mode<synchronous>, transform_indices = @transform_2, window_bounds = array<i64: 8, 1>}, {transform_indices = @transform_3, window_bounds = array<i64: 1, 8, 256>}]} {
    %c0 = arith.constant 0 : index
    %c0_0 = arith.constant 0 : index
    %0 = vector.load %arg2[%c0, %c0_0] : memref<8x36xbf16, #tpu.memory_space<vmem>>, vector<8x36xbf16>
    %c0_1 = arith.constant 0 : index
    %c0_2 = arith.constant 0 : index
    %c0_3 = arith.constant 0 : index
    %1 = vector.load %arg3[%c0_1, %c0_2, %c0_3] : memref<1x36x256xbf16, #tpu.memory_space<vmem>>, vector<1x36x256xbf16>
    %2 = vector.shape_cast %1 : vector<1x36x256xbf16> to vector<36x256xbf16>
    %cst = arith.constant dense<0.000000e+00> : vector<8x256xf32>
    %3 = tpu.matmul %0, %2, %cst {dimension_numbers = #tpu.dot_dimension_numbers<[1], [0], [0], [1], [0, 0, 1, 1], [], []>} : vector<8x36xbf16>, vector<36x256xbf16>, vector<8x256xf32> -> vector<8x256xf32>
    %c0_4 = arith.constant 0 : index
    %c0_5 = arith.constant 0 : index
    %4 = vector.load %arg4[%c0_4, %c0_5] : memref<8x1xf32, #tpu.memory_space<vmem>>, vector<8x1xf32>
    %5 = vector.broadcast %4 : vector<8x1xf32> to vector<8x256xf32>
    %6 = arith.addf %3, %5 : vector<8x256xf32>
    %cst_6 = arith.constant 0.000000e+00 : f32
    %7 = vector.broadcast %cst_6 : f32 to vector<8x256xf32>
    %8 = arith.cmpf oge, %6, %7 : vector<8x256xf32>
    %cst_7 = arith.constant 2.000000e-01 : f32
    %9 = vector.broadcast %cst_7 : f32 to vector<8x256xf32>
    %10 = arith.mulf %9, %6 : vector<8x256xf32>
    %11 = arith.select %8, %6, %10 : vector<8x256xi1>, vector<8x256xf32>
    %c0_8 = arith.constant 0 : index
    %c0_9 = arith.constant 0 : index
    %c0_10 = arith.constant 0 : index
    %12 = vector.load %arg5[%c0_8, %c0_9, %c0_10] : memref<1x8x256xf32, #tpu.memory_space<vmem>>, vector<1x8x256xf32>
    %13 = vector.shape_cast %12 : vector<1x8x256xf32> to vector<8x256xf32>
    %14 = vector.shape_cast %11 : vector<8x256xf32> to vector<1x8x256xf32>
    tpu.vector_store %arg5[%c0_8, %c0_9, %c0_10], %14 {strides = array<i32>} : memref<1x8x256xf32, #tpu.memory_space<vmem>>, vector<1x8x256xf32>,
    return
  }
  func.func @transform_0(%arg0: i32, %arg1: i32) -> (i32, i32) {
    %c0_i32 = arith.constant 0 : i32
    %c0_i32_0 = arith.constant 0 : i32
    %c0_i32_1 = arith.constant 0 : i32
    return %c0_i32, %c0_i32_0 : i32, i32
  }
  func.func @transform_1(%arg0: i32, %arg1: i32) -> (i32, i32, i32) {
    %c0_i32 = arith.constant 0 : i32
    %c0_i32_0 = arith.constant 0 : i32
    return %arg0, %c0_i32, %arg1 : i32, i32, i32
  }
  func.func @transform_2(%arg0: i32, %arg1: i32) -> (i32, i32) {
    %c0_i32 = arith.constant 0 : i32
    %c0_i32_0 = arith.constant 0 : i32
    %c0_i32_1 = arith.constant 0 : i32
    return %c0_i32, %c0_i32_0 : i32, i32
  }
  func.func @transform_3(%arg0: i32, %arg1: i32) -> (i32, i32, i32) {
    %c0_i32 = arith.constant 0 : i32
    %c0_i32_0 = arith.constant 0 : i32
    return %arg0, %c0_i32, %arg1 : i32, i32, i32
  }
}

</mosaic_0001>

<bundles_post_ra>
// kernel: tpu_custom_call.1
= control target key start
LH: loop header
LB: loop body
LE: loop exit
PB: predicated region body
PF: predicated region fallthrough
CT: control target
= control target key end

     0   :  { %8 = vsyncpa [#allocation3], 0  ;;  %s689_s0 = inlined_call_operand.vmem [shape: bf16[8,36], index: 0, kind: input, shape index: {}]   ;;  %s690_s1 = inlined_call_operand.vmem [shape: bf16[2,36,256], index: 1, kind: input, shape index: {}]   ;;  %s691_s2 = inlined_call_operand.vmem [shape: f32[8,1], index: 2, kind: input, shape index: {}]   ;;  %s692_s3 = inlined_call_operand.hbm [shape: f32[2,8,256], index: 3, kind: output, shape index: {}]  }
   0x1   :  { %10 = vsyncpa [#allocation3 + $0x1], 0  ;;  %s578_s12 = smov 0   ;;  %s580_s13 = smov 0  }
   0x2   :  { %s582_s14 = smov 0   ;;  %s584_s15 = smov 0  }
   0x3   :  { %s586_s16 = smov 0   ;;  %s588_s17 = smov 0  }
   0x4 LB: > { %s391_s18 = sadd.s32 4294967295, %s554_s17   ;;  %s392_s19 = sadd.s32 4294967294, %s554_s17   ;;  %s554_s17 = sphi %s588_s17, %s16_s17   ;;  %s550_s16 = sphi %s586_s16, %s699_s16   ;;  %s546_s15 = sphi %s584_s15, %s698_s15   ;;  %s542_s14 = sphi %s582_s14, %s697_s14   ;;  %s538_s13 = sphi %s580_s13, %s696_s13   ;;  %s534_s12 = sphi %s578_s12, %s695_s12  }
   0x5   : > { %s28_s20 = sadd.s32 1, %s550_s16  ;;  %s107_s21 = sadd.s32 1, %s542_s14 }
   0x6   : > { %p30_p0 = scmp.ge.s32.totalorder %s28_s20, 2  ;;  %p117_p1 = scmp.ne.s32.totalorder %s542_s14, %s538_s13 }
   0x7   : > { %p118_p2 = scmp.eq.s32.totalorder %s391_s18, 1  ;;  %p123_p3 = scmp.ne.s32.totalorder %s538_s13, %s534_s12 }
   0x8   : > { %s701_s20 = smov (%p30_p0, %s28_s20), 0  ;;  %p124_p5 = scmp.eq.s32.totalorder %s392_s19, 1 }
   0x9   : > { %p618_p4 = por %p118_p2, %p117_p1  ;;  %s102_s23 = ssub.s32 %s550_s16, %s701_s20 }
   0xa   : > { %p395_p6 = scmp.ge.s32.totalorder %s554_s17, 1  ;;  %p105_p7 = scmp.eq.s32.totalorder %s102_s23, 0 }
   0xb   : > { %p625_p8 = por %p124_p5, %p123_p3  ;;  %p161_p9 = scmp.lt.s32.totalorder %s554_s17, 3 }
   0xc   : > { %s631_s25 = scalar_select %p105_p7, %s542_s14, %s107_s21  }
   0xd   : > { %p162_p10 = pnand %p395_p6, %p161_p9 }
   0xe   : > { %p190_p11 = scmp.lt.s32.totalorder (!%p162_p10), %s546_s15, 1  ;;  %s186_s8 = sand.u32 (!%p162_p10), 1, %s538_s13  }
   0xf   : > { %165 = sbr.rel (%p162_p10) target bundleno = 253 (0xfd), region = 32  ;;  %s396_s9 = sshll.u32 (!%p162_p10), %s186_s8, 4 }
  0x10   : > { %s411_s10 = sshll.u32 (!%p162_p10), %s546_s15, 8  ;;  %s188_s11 = scalar_lea.vmem (!%p162_p10), [#allocation2], %s396_s9 }
  0x11   : > { %s315_s18 = sshll.u32 (!%p162_p10), %s188_s11, 4  ;;  %s649_s23 = scalar_lea.hbm (!%p162_p10), %s692_s3, %s411_s10  ;;  %s316_s18 = int_to_ptr.vmem [resolvable:$true] %s315_s18 }
  0x12   : > { %s299_s26 = scalar_lea.sflag (!%p162_p10), [#allocation3], %s186_s8  ;;  %s478_s27 = scalar_lea.vmem (!%p162_p10), %s316_s18, 256 }
  0x13   : > { %p479_p12 = scmp.ne.s32.totalorder (!%p162_p10), %s316_s18, %s478_s27 }
  0x14   : > { %v556_v0 = vmov 0   ;;  %v207_v1 = vld [vmem:[%s691_s2] sm:$0xff]  ;;  %s191_s28 = scalar_select %p190_p11, %s546_s15, 1  ;;  %vm242_vm0 = vcmask 1041408   ;;  %vm238_vm1 = vcmask 293888  }
  0x15   : > { %281 = vmatprep.mubr.bf16.mxu0 %v556_v0  ;;  %469 = vset.pattern.permute.xlu0 %v556_v0  ;;  %v201_v10 = vld [vmem:[%s689_s0] sm:$0xf]  ;;  %p480_p13 = pnand %p479_p12, %p618_p4  ;;  %s557_s15 = smov [#allocation2]  }
  0x16   : > { %210 = vperm.xlu0 %469, %v207_v1   ;;  %s412_s29 = smul.u32 40, %s191_s28  ;;  %s482_s28 = sshll.u32 %s557_s15, 4  ;;  %s483_s28 = int_to_ptr.vmem [resolvable:$false] %s482_s28 }
  0x17   : > { %p481_p0 = pneg %p480_p13  ;;  %p485_p1 = scmp.lt.s32.totalorder %s316_s18, %s483_s28 }
  0x18   : > { %s197_s5 = scalar_lea.vmem %s690_s1, %s412_s29  ;;  %s484_s29 = scalar_lea.vmem %s483_s28, 512 }
  0x19   : > { %v206_v2 = vld [vmem:[%s197_s5 + $0x20] sm:$0x33]  ;;  %v472_v5 = vld [vmem:[%s197_s5 + $0x14] ss:$8 sps:$4 sm:$0xff]   ;;  %v474_v7 = vld [vmem:[%s197_s5 + $0x10] ss:$8 sps:$4 sm:$0xff]   ;;  %p486_p2 = scmp.lt.s32.totalorder %s484_s29, %s478_s27 }
  0x1a   : > { %v403_v3 = vcombine.high %v206_v2, %v206_v2  ;;  %v402_v4 = vcombine.low %v206_v2, %v206_v2  ;;  %v475_v8 = vld [vmem:[%s197_s5 + $0x4] ss:$8 sps:$4 sm:$0xff]   ;;  %v477_v9 = vld [vmem:[%s197_s5] ss:$8 sps:$4 sm:$0xff]  }
  0x1b   : > { %p487_p3 = por %p486_p2, %p485_p1 }
  0x1c   : > { %404 = vmatprep.subr.msk.bf16.mxu0 %vm242_vm0, %v403_v3  ;;  %v244_v6 = vsel %vm242_vm0, %v402_v4, 0 }
  0x1d   : > { %260 = vmatpush1.bf16.msra.mxu0 %v244_v6  ;;  %p488_p5 = pnand %p487_p3, %p481_p0 }
  0x1e   : > { %261 = vmatprep.subr.bf16.mxu0 %v472_v5 }
  0x21   : > { %262 = vmatpush1.bf16.msra.mxu0 %v474_v7 }
  0x22   : > { %263 = vmatprep.subr.bf16.mxu0 %v475_v8 }
  0x25   : > { %264 = vmatpush1.bf16.msra.mxu0 %v477_v9 }
  0x28   : > { %405 = vmatmul.mubr.msk.bf16.vlgmr.msra.gmra.mxu0 %vm238_vm1, %v201_v10 }
  0x91   : > { %v211_v11 = vpop.permute.xlu0 %210 }
  0xe8   : > { %v283_v12 = vpop.f32.mrf.mxu0 }
  0xe9   : > { %v284_v13 = vadd.f32 %v283_v12, %v211_v11 }
  0xea   : > { %v285_v14 = vpop.f32.mrf.mxu0 }
  0xeb   : > { %vm290_vm2 = vcmp.ge.f32.partialorder %v284_v13, 0.0  ;;  %v292_v15 = vmul.f32 0.2, %v284_v13  ;;  %v286_v16 = vadd.f32 %v285_v14, %v211_v11 }
  0xec   : > { %v287_v17 = vpop.f32.mrf.mxu0 }
  0xed   : > { %v294_v18 = vsel %vm290_vm2, %v284_v13, %v292_v15  ;;  %vm291_vm3 = vcmp.ge.f32.partialorder %v286_v16, 0.0  ;;  %v293_v19 = vmul.f32 0.2, %v286_v16 }
  0xee   : > { %v288_v20 = vpop.f32.mrf.mxu0  ;;  %296 = vst [vmem:[%s188_s11] sm:$0xff] %v294_v18 }
  0xef   : > { %v295_v21 = vsel %vm291_vm3, %v286_v16, %v293_v19 }
  0xf0   : > { %297 = vst [vmem:[%s188_s11 + $0x8] sm:$0xff] %v295_v21 }
  0xf1   : > { %491 = shalt.err (!%p488_p5)
}
  0xf2   : > { %s492_s30 = scalar_lea.hbm %s649_s23, 256  ;;  %s496_s6 = scalar_lea.hbm %s692_s3, 512 }
  0xf3   : > { %p493_p6 = scmp.ne.s32.totalorder %s649_s23, %s492_s30  ;;  %p497_p10 = scmp.lt.s32.totalorder %s649_s23, %s692_s3 }
  0xf4   : > { %p498_p11 = scmp.lt.s32.totalorder %s496_s6, %s492_s30 }
  0xf5   : > { %p494_p7 = pnand %p493_p6, %p618_p4 }
  0xf6   : > { %p499_p12 = por %p498_p11, %p497_p10 }
  0xf7   : > { %p495_p9 = pneg %p494_p7 }
  0xf9   : > { %p500_p13 = pnand %p499_p12, %p495_p9 }
  0xfb   : > { %503 = shalt.err (!%p500_p13)
}
  0xfc   : > { %413 = dma.vmem_to_hbm [thread:$0]  (%p618_p4), %s316_s18, 256, %s649_s23, %s299_s26  }
  0xfd PF: > { %p419_p0 = scmp.ge.s32.totalorder %s554_s17, 2  ;;  %s327_s9 = sand.u32 1, %s534_s12  }
  0xfe   : > { %s328_s10 = scalar_lea.sflag [#allocation3], %s327_s9 }
  0xff   : > { %p416_p1 = pnand %p419_p0, %p625_p8 }
 0x101   : > { %p417_p2 = pneg %p416_p1 }
 0x103   : > { %529 = dma.done.wait (%p417_p2), %s328_s10, 256  }
 0x104   : > { %531 = vsyncadd (%p417_p2), %s328_s10, 4294967040  ;;  %s16_s17 = sadd.s32 1, %s554_s17   ;;  %s695_s12 = smov %s538_s13 }
 0x105   : > { %p13_p3 = scmp.ge.s32.totalorder %s16_s17, 4   ;;  %s696_s13 = smov %s542_s14 }
 0x106   : > { %s697_s14 = smov %s631_s25  ;;  %s698_s15 = smov %s550_s16 }
 0x107   : > { %s699_s16 = smov %s701_s20  ;;  %15 = sbr.rel (!%p13_p3) target bundleno = 4 (0x4), region = 67 }
 0x10c   :  { %333 = vsyncpa [#allocation3], 1 }
 0x10d   :  { %335 = vsyncpa [#allocation3 + $0x1], 1 }

</bundles_post_ra>
